<compile_context>
chip_gen: v6e
topology: v6e:2x2x1
jax: 0.10.0
libtpu: 0.0.40
codegen_flags: <defaults>
</compile_context>

<pallas_src>
import functools

import jax
import jax.numpy as jnp
from jax.experimental import pallas as pl
from jax.experimental.pallas import tpu as pltpu


def _touch_sum_kernel(x_ref, o_ref, *, tile_rows, total_rows):
    """Accumulate sum(x) into a resident (1,1) f32 output block."""
    i = pl.program_id(0)

    @pl.when(i == 0)
    def _():
        o_ref[...] = jnp.zeros_like(o_ref)

    x = x_ref[...].astype(jnp.float32)

    # Static trace-time branch: only mask when the last block is ragged.
    if total_rows % tile_rows != 0:
        row_ids = i * tile_rows + jax.lax.broadcasted_iota(jnp.int32, x.shape, 0)
        x = jnp.where(row_ids < total_rows, x, 0.0)

    o_ref[...] = o_ref[...] + jnp.sum(x)


def _touch_sum(x, *, max_tile_bytes=4 * 1024 * 1024):
    """Read-only TPU 'touch': returns sum(x) as a (1,1) float32 array.

    Works for any rank; last dim stays full-width (lane-dense), only the
    collapsed leading 'row' axis is tiled.
    """
    # Collapse to 2-D with the original last dim kept as the lane axis.
    if x.ndim == 0:
        x2 = x.reshape(1, 1)
    elif x.ndim == 1:
        x2 = x.reshape(1, x.shape[0])
    else:
        x2 = x.reshape(-1, x.shape[-1])

    rows, cols = x2.shape
    itemsize = jnp.dtype(x2.dtype).itemsize
    row_bytes = max(cols * itemsize, 1)

    # Rows per block under the VMEM budget, rounded down to a multiple of 8.
    budget_rows = max(8, (max_tile_bytes // row_bytes) // 8 * 8)

    if rows <= budget_rows:
        tr = rows          # single full-extent block: no masking, no OOB reads
    else:
        tr = budget_rows   # multiple of 8; ragged tail masked in-kernel

    grid = (pl.cdiv(rows, tr),)
    kernel = functools.partial(_touch_sum_kernel, tile_rows=tr, total_rows=rows)

    return pl.pallas_call(
        kernel,
        out_shape=jax.ShapeDtypeStruct((1, 1), jnp.float32),
        grid_spec=pltpu.PrefetchScalarGridSpec(
            num_scalar_prefetch=0,
            grid=grid,
            # Full-width last dim -> lane-dense, unmasked vector loads.
            in_specs=[pl.BlockSpec((tr, cols), lambda i: (i, 0))],
            # Same output block across the whole grid -> resident accumulator.
            out_specs=pl.BlockSpec((1, 1), lambda i: (0, 0)),
        ),
        compiler_params=pltpu.CompilerParams(
            dimension_semantics=("arbitrary",),   # reduction axis
            vmem_limit_bytes=32 * 1024 * 1024,    # safe on v7x (64 MiB/TC)
            has_side_effects=True,                # never DCE'd under jit
        ),
        cost_estimate=pl.CostEstimate(
            flops=rows * cols,
            transcendentals=0,
            bytes_accessed=rows * cols * itemsize + 4,
        ),
    )(x2)


class TestModuleJax:
    """JAX equivalent of the PyTorch TestModule.

    Submodule carries only integer attributes (exported=1, not_exported=2)
    and no parameters; its forward returns None.
    """

    def __init__(self, debug_touch=False):
        self.exported = 1
        self.not_exported = 2
        self._debug_touch = debug_touch
        self._last_touch = None

    def forward(self, tensor):
        # Hot path: the reference forward performs no tensor computation, so
        # the fastest correct implementation is zero HBM traffic and zero
        # kernel dispatch on every TPU generation.
        if self._debug_touch:
            # Optional read-only TPU touch (debug/testing only).  Its result
            # is retained (consumed) and the kernel is marked side-effecting,
            # so it cannot be dead-code-eliminated under jax.jit.
            self._last_touch = _touch_sum(tensor)
        # TODO(synk): the reference forward has no computation to express;
        # Submodule.forward() -> not_exported_method() -> None.
        return None


if __name__ == "__main__":
    key = jax.random.PRNGKey(0)

    # Small deterministic input; the module places no constraint on shape.
    x = jax.random.normal(key, (2, 4, 16, 32), dtype=jnp.float32)

    # 1) Exercise the single-block reduction path and block on the result.
    s = jax.block_until_ready(_touch_sum(x))
    ref = jnp.sum(x.astype(jnp.float32))
    assert jnp.allclose(s[0, 0], ref, rtol=1e-5, atol=1e-4), "sum touch mismatch"

    # 2) Exercise the row-tiled path with a ragged tail block (forced small
    #    tile budget) to validate the in-kernel masking.
    x_rag = jax.random.normal(jax.random.PRNGKey(0), (37, 128), dtype=jnp.float32)
    s_rag = jax.block_until_ready(_touch_sum(x_rag, max_tile_bytes=4096))
    ref_rag = jnp.sum(x_rag.astype(jnp.float32))
    assert jnp.allclose(s_rag[0, 0], ref_rag, rtol=1e-5, atol=1e-4), "tiled touch mismatch"

    # 3) Module forward: must return None, exactly like the PyTorch reference,
    #    and performs no device work on the hot path.
    module = TestModuleJax()
    result = module.forward(x)
    assert result is None

    # 4) Debug-touch branch still returns None and its kernel result is
    #    consumed (kept on the module) so it is never DCE'd.
    dbg = TestModuleJax(debug_touch=True)
    assert dbg.forward(x) is None
    jax.block_until_ready(dbg._last_touch)

    print("KERNEL_OK")
</pallas_src>

<mosaic_0001>
module attributes {stable_mosaic.version = 11 : i64} {
  func.func @_touch_sum_kernel(%arg0: i32, %arg1: memref<128x32xf32, #tpu.memory_space<vmem>>, %arg2: memref<1x1xf32, #tpu.memory_space<vmem>>) attributes {dimension_semantics = [#tpu.dimension_semantics<arbitrary>], iteration_bounds = array<i64: 1>, scalar_prefetch = 0 : i64, scratch_operands = 0 : i64, tpu.core_type = #tpu.core_type<tc>, window_params = [{transform_indices = @transform_0, window_bounds = array<i64: 128, 32>}, {pipeline_mode = #tpu.pipeline_mode<synchronous>, transform_indices = @transform_1, window_bounds = array<i64: 1, 1>}]} {
    %c0_i32 = arith.constant 0 : i32
    %0 = arith.cmpi eq, %arg0, %c0_i32 : i32
    %1 = arith.extui %0 : i1 to i32
    %c0_i32_0 = arith.constant 0 : i32
    %2 = arith.cmpi ne, %1, %c0_i32_0 : i32
    scf.if %2 {
      %cst_6 = arith.constant 0.000000e+00 : f32
      %12 = vector.broadcast %cst_6 : f32 to vector<1x1xf32>
      %c0_7 = arith.constant 0 : index
      %c0_8 = arith.constant 0 : index
      %13 = vector.load %arg2[%c0_7, %c0_8] : memref<1x1xf32, #tpu.memory_space<vmem>>, vector<1x1xf32>
      tpu.vector_store %arg2[%c0_7, %c0_8], %12 {strides = array<i32>} : memref<1x1xf32, #tpu.memory_space<vmem>>, vector<1x1xf32>,
    } else {
    }
    %c0 = arith.constant 0 : index
    %c0_1 = arith.constant 0 : index
    %3 = vector.load %arg1[%c0, %c0_1] : memref<128x32xf32, #tpu.memory_space<vmem>>, vector<128x32xf32>
    %c0_2 = arith.constant 0 : index
    %c0_3 = arith.constant 0 : index
    %4 = vector.load %arg2[%c0_2, %c0_3] : memref<1x1xf32, #tpu.memory_space<vmem>>, vector<1x1xf32>
    %5 = vector.shape_cast %3 : vector<128x32xf32> to vector<1x128x32xf32>
    %cst = arith.constant dense<0.000000e+00> : vector<1xf32>
    %6 = vector.multi_reduction <add>, %5, %cst [1, 2] : vector<1x128x32xf32> to vector<1xf32>
    %7 = vector.shape_cast %6 : vector<1xf32> to vector<1x1x1xf32>
    %8 = vector.extract %7[0, 0, 0] : f32 from vector<1x1x1xf32>
    %9 = vector.broadcast %8 : f32 to vector<1x1xf32>
    %10 = arith.addf %4, %9 : vector<1x1xf32>
    %c0_4 = arith.constant 0 : index
    %c0_5 = arith.constant 0 : index
    %11 = vector.load %arg2[%c0_4, %c0_5] : memref<1x1xf32, #tpu.memory_space<vmem>>, vector<1x1xf32>
    tpu.vector_store %arg2[%c0_4, %c0_5], %10 {strides = array<i32>} : memref<1x1xf32, #tpu.memory_space<vmem>>, vector<1x1xf32>,
    return
  }
  func.func @transform_0(%arg0: i32) -> (i32, i32) {
    %c0_i32 = arith.constant 0 : i32
    %c0_i32_0 = arith.constant 0 : i32
    return %arg0, %c0_i32 : i32, i32
  }
  func.func @transform_1(%arg0: i32) -> (i32, i32) {
    %c0_i32 = arith.constant 0 : i32
    %c0_i32_0 = arith.constant 0 : i32
    %c0_i32_1 = arith.constant 0 : i32
    return %c0_i32, %c0_i32_0 : i32, i32
  }
}

</mosaic_0001>

<bundles_post_ra>
// kernel: tpu_custom_call.1
= control target key start
LH: loop header
LB: loop body
LE: loop exit
PB: predicated region body
PF: predicated region fallthrough
CT: control target
= control target key end

     0   :  { %vm32_vm0 = vcmask 261120   ;;  %s198_s0 = inlined_call_operand.vmem [shape: f32[128,32], index: 0, kind: input, shape index: {}]   ;;  %s199_s1 = inlined_call_operand.hbm [shape: f32[1,1], index: 1, kind: output, shape index: {}]  }
   0x1   :  { %v15_v0 = vld [vmem:[%s198_s0] sm:$0xff]  ;;  %v16_v1 = vld [vmem:[%s198_s0 + $0x8] sm:$0xff]  ;;  %v17_v2 = vld [vmem:[%s198_s0 + $0x10] sm:$0xff] }
   0x2   :  { %v18_v3 = vld [vmem:[%s198_s0 + $0x18] sm:$0xff]  ;;  %v33_v4 = vsel %vm32_vm0, %v15_v0, 0.0  ;;  %v34_v5 = vsel %vm32_vm0, %v16_v1, 0.0  ;;  %v36_v6 = vsel %vm32_vm0, %v17_v2, 0.0  ;;  %v19_v7 = vld [vmem:[%s198_s0 + $0x20] sm:$0xff]  ;;  %v20_v10 = vld [vmem:[%s198_s0 + $0x28] sm:$0xff] }
   0x3   :  { %v35_v8 = vadd.f32 %v34_v5, %v33_v4  ;;  %v38_v9 = vsel %vm32_vm0, %v18_v3, 0.0  ;;  %v40_v12 = vsel %vm32_vm0, %v19_v7, 0.0 }
   0x5   :  { %v37_v11 = vadd.f32 %v36_v6, %v35_v8 }
   0x6   :  { %6 = vsyncpa [#allocation3], 0  ;;  %v21_v13 = vld [vmem:[%s198_s0 + $0x30] sm:$0xff]  ;;  %v42_v15 = vsel %vm32_vm0, %v20_v10, 0.0  ;;  %v22_v16 = vld [vmem:[%s198_s0 + $0x38] sm:$0xff]  ;;  %vm13_vm1 = vcmask 0  }
   0x7   :  { %v39_v14 = vadd.f32 %v38_v9, %v37_v11  ;;  %v44_v18 = vsel %vm32_vm0, %v21_v13, 0.0  ;;  %v23_v19 = vld [vmem:[%s198_s0 + $0x40] sm:$0xff]  ;;  %v46_v21 = vsel %vm32_vm0, %v22_v16, 0.0  ;;  %v24_v22 = vld [vmem:[%s198_s0 + $0x48] sm:$0xff]  ;;  %v25_v25 = vld [vmem:[%s198_s0 + $0x50] sm:$0xff]  ;;  %v117_v47 = vmov 0.0  }
   0x8   :  { %v48_v24 = vsel %vm32_vm0, %v23_v19, 0.0  ;;  %v50_v27 = vsel %vm32_vm0, %v24_v22, 0.0  ;;  %v26_v28 = vld [vmem:[%s198_s0 + $0x58] sm:$0xff]  ;;  %v52_v30 = vsel %vm32_vm0, %v25_v25, 0.0  ;;  %v27_v31 = vld [vmem:[%s198_s0 + $0x60] sm:$0xff]  ;;  %v28_v34 = vld [vmem:[%s198_s0 + $0x68] sm:$0xff] }
   0x9   :  { %v41_v17 = vadd.f32 %v40_v12, %v39_v14  ;;  %v54_v33 = vsel %vm32_vm0, %v26_v28, 0.0  ;;  %v56_v36 = vsel %vm32_vm0, %v27_v31, 0.0  ;;  %v29_v37 = vld [vmem:[%s198_s0 + $0x70] sm:$0xff]  ;;  %v58_v39 = vsel %vm32_vm0, %v28_v34, 0.0  ;;  %v30_v40 = vld [vmem:[%s198_s0 + $0x78] sm:$0xff]  ;;  %s118_s0 = smov [#allocation2]  }
   0xa   :  { %v60_v42 = vsel %vm32_vm0, %v29_v37, 0.0  ;;  %v62_v44 = vsel %vm32_vm0, %v30_v40, 0.0  ;;  %14 = vst.msk [vmem:[#allocation2] sm:$0x1] %vm13_vm1, %v117_v47  ;;  %s83_s9 = sshll.u32 %s118_s0, 4  ;;  %s84_s9 = int_to_ptr.vmem [resolvable:$true] %s83_s9 }
   0xb   :  { %v43_v20 = vadd.f32 %v42_v15, %v41_v17  ;;  %s95_s11 = scalar_lea.vmem %s84_s9, 16  ;;  %s99_s12 = scalar_lea.vmem %s84_s9, 32 }
   0xc   :  { %p96_p0 = scmp.ne.s32.totalorder %s84_s9, %s95_s11  ;;  %p100_p1 = scmp.lt.s32.totalorder %s84_s9, %s84_s9 }
   0xd   :  { %v45_v23 = vadd.f32 %v44_v18, %v43_v20  ;;  %p101_p2 = scmp.lt.s32.totalorder %s99_s12, %s95_s11 }
   0xf   :  { %v47_v26 = vadd.f32 %v46_v21, %v45_v23  ;;  %p102_p3 = por %p101_p2, %p100_p1 }
  0x11   :  { %v49_v29 = vadd.f32 %v48_v24, %v47_v26  ;;  %v31_v55 = vld [vmem:[#allocation2] sm:$0x1]  ;;  %p103_p4 = pnand %p102_p3, %p96_p0 }
  0x13   :  { %v51_v32 = vadd.f32 %v50_v27, %v49_v29 }
  0x15   :  { %v53_v35 = vadd.f32 %v52_v30, %v51_v32 }
  0x17   :  { %v55_v38 = vadd.f32 %v54_v33, %v53_v35 }
  0x19   :  { %v57_v41 = vadd.f32 %v56_v36, %v55_v38 }
  0x1b   :  { %v59_v43 = vadd.f32 %v58_v39, %v57_v41 }
  0x1d   :  { %v61_v45 = vadd.f32 %v60_v42, %v59_v43 }
  0x1f   :  { %v63_v46 = vadd.f32 %v62_v44, %v61_v45 }
  0x21   :  { %64 = vadd.xlane.f32.xlu0 %v63_v46 }
  0xaa   :  { %v65_v48 = vpop.xlane.xlu0 %64 }
  0xab   :  { %v66_v49 = vrot.slane %v65_v48, 4 }
  0xad   :  { %v67_v50 = vadd.f32 %v66_v49, %v65_v48 }
  0xaf   :  { %v68_v51 = vrot.slane %v67_v50, 2 }
  0xb1   :  { %v69_v52 = vadd.f32 %v68_v51, %v67_v50 }
  0xb3   :  { %v70_v53 = vrot.slane %v69_v52, 1 }
  0xb5   :  { %v71_v54 = vadd.f32 %v70_v53, %v69_v52 }
  0xb7   :  { %91 = vpush %v71_v54 }
  0xe8   :  { %s92_s10 = spop %91 }
  0xe9   :  { %v73_v56 = vstv %s92_s10 }
  0xea   :  { %v74_v57 = vadd.f32 %v73_v56, %v31_v55 }
  0xec   :  { %76 = vst.msk [vmem:[#allocation2] sm:$0x1] %vm13_vm1, %v74_v57 }
  0xed   :  { %106 = shalt.err (!%p103_p4)
}
  0xee   :  { %86 = dma.vmem_to_hbm [thread:$0]  %s84_s9, 16, %s199_s1, [#allocation3]  }
  0xef   :  { %115 = dma.done.wait [#allocation3], 16  }
  0xf0   :  { %116 = vsyncadd [#allocation3], 4294967280 }
  0xf1   :  { %90 = vsyncpa [#allocation3], 1 }

</bundles_post_ra>
